<compile_context>
chip_gen: v6e
topology: v6e:2x2x1
jax: 0.10.0
libtpu: 0.0.40
codegen_flags: <defaults>
</compile_context>

<pallas_src>
import functools

import jax
import jax.numpy as jnp
from jax.experimental import pallas as pl
from jax.experimental.pallas import tpu as pltpu

N_FEATURES = 28 * 28        # 784
N_HIDDEN_1 = 128
N_HIDDEN_2 = 64


def _sigmoid(h):
    # exp on the EUP, approx reciprocal on the EUP -> no f32 VALU divide.
    return pl.reciprocal(1.0 + jnp.exp(-h), approx=True)


def encoder_kernel(x_ref, w1_ref, b1_ref, w2_ref, b2_ref, out_ref):
    # In-kernel f32 -> bf16 cast (VPU, free under the HBM stream).
    x = x_ref[...].astype(jnp.bfloat16)
    # Layer 1: (tm, 784) bf16 @ (784, 128) bf16 -> f32 accumulate on MXU.
    h1 = jnp.dot(x, w1_ref[...], preferred_element_type=jnp.float32)
    f1 = _sigmoid(h1 + b1_ref[...])
    # Layer 2: (tm, 128) bf16 @ (128, 64) bf16 -> f32.
    h2 = jnp.dot(f1.astype(jnp.bfloat16), w2_ref[...],
                 preferred_element_type=jnp.float32)
    out_ref[...] = _sigmoid(h2 + b2_ref[...]).astype(out_ref.dtype)


def prepare_params(w1, b1, w2, b2):
    """One-time cast of logical f32 params into kernel layout (no padding)."""
    w1p = jnp.asarray(w1).astype(jnp.bfloat16)                    # (784, 128)
    b1p = jnp.asarray(b1, jnp.float32).reshape(1, N_HIDDEN_1)     # (1, 128)
    w2p = jnp.asarray(w2).astype(jnp.bfloat16)                    # (128, 64)
    b2p = jnp.asarray(b2, jnp.float32).reshape(1, N_HIDDEN_2)     # (1, 64)
    return w1p, b1p, w2p, b2p


def _round_up(v, m):
    return ((v + m - 1) // m) * m


@functools.partial(jax.jit, static_argnames=("tm",))
def encoder_forward(x, w1p, b1p, w2p, b2p, *, tm=1024):
    B = x.shape[0]
    x = x.astype(jnp.float32)

    # Batch tile: multiple of 16 (bf16 sublane packing); keep >= 2 grid tiles
    # when the batch allows so v7x can shard the parallel axis across 2 TCs.
    b16 = _round_up(max(B, 16), 16)
    if b16 >= 32:
        half = _round_up((b16 + 1) // 2, 16)
        tm_eff = max(16, min(tm, half))
    else:
        tm_eff = 16
    b_pad = _round_up(B, tm_eff)
    if b_pad != B:
        x = jnp.pad(x, ((0, b_pad - B), (0, 0)))

    grid = (b_pad // tm_eff,)

    cost = pl.CostEstimate(
        flops=2 * b_pad * N_FEATURES * N_HIDDEN_1
              + 2 * b_pad * N_HIDDEN_1 * N_HIDDEN_2,
        transcendentals=2 * b_pad * (N_HIDDEN_1 + N_HIDDEN_2),
        bytes_accessed=(b_pad * N_FEATURES * 4          # x, f32
                        + w1p.size * 2 + w2p.size * 2   # bf16 weights
                        + b1p.size * 4 + b2p.size * 4   # f32 biases
                        + b_pad * N_HIDDEN_2 * 4),      # out, f32
    )

    out = pl.pallas_call(
        encoder_kernel,
        out_shape=jax.ShapeDtypeStruct((b_pad, N_HIDDEN_2), jnp.float32),
        grid=grid,
        in_specs=[
            pl.BlockSpec((tm_eff, N_FEATURES), lambda i: (i, 0)),     # x tile
            pl.BlockSpec((N_FEATURES, N_HIDDEN_1), lambda i: (0, 0)), # W1 (resident)
            pl.BlockSpec((1, N_HIDDEN_1), lambda i: (0, 0)),          # b1
            pl.BlockSpec((N_HIDDEN_1, N_HIDDEN_2), lambda i: (0, 0)), # W2 (resident)
            pl.BlockSpec((1, N_HIDDEN_2), lambda i: (0, 0)),          # b2
        ],
        out_specs=pl.BlockSpec((tm_eff, N_HIDDEN_2), lambda i: (i, 0)),
        compiler_params=pltpu.CompilerParams(
            dimension_semantics=("parallel",),
            vmem_limit_bytes=32 << 20),
        cost_estimate=cost,
    )(x, w1p, b1p, w2p, b2p)

    if b_pad != B:
        out = out[:B]
    return out


def init_params(key):
    # Deterministic init mimicking nn.Linear's uniform(-1/sqrt(fan_in), ...).
    k1, k2, k3, k4 = jax.random.split(key, 4)
    lim1 = 1.0 / jnp.sqrt(jnp.float32(N_FEATURES))
    lim2 = 1.0 / jnp.sqrt(jnp.float32(N_HIDDEN_1))
    w1 = jax.random.uniform(k1, (N_FEATURES, N_HIDDEN_1), jnp.float32, -lim1, lim1)
    b1 = jax.random.uniform(k2, (N_HIDDEN_1,), jnp.float32, -lim1, lim1)
    w2 = jax.random.uniform(k3, (N_HIDDEN_1, N_HIDDEN_2), jnp.float32, -lim2, lim2)
    b2 = jax.random.uniform(k4, (N_HIDDEN_2,), jnp.float32, -lim2, lim2)
    return w1, b1, w2, b2


if __name__ == "__main__":
    key = jax.random.PRNGKey(0)
    kx, kp = jax.random.split(key)

    B = 8  # small test batch
    x = jax.random.normal(kx, (B, N_FEATURES), jnp.float32)
    w1, b1, w2, b2 = init_params(kp)
    w1p, b1p, w2p, b2p = prepare_params(w1, b1, w2, b2)

    out = encoder_forward(x, w1p, b1p, w2p, b2p)
    out = jax.block_until_ready(out)

    # Pure-JAX f32 reference (bf16 weights/activations in the kernel ->
    # relaxed tolerance).
    ref = jax.nn.sigmoid(jax.nn.sigmoid(x @ w1 + b1) @ w2 + b2)
    assert out.shape == (B, N_HIDDEN_2)
    assert jnp.allclose(out, ref, atol=2e-2, rtol=2e-2), (
        float(jnp.max(jnp.abs(out - ref))))

    print("KERNEL_OK")
</pallas_src>

<mosaic_0001>
module attributes {stable_mosaic.version = 11 : i64} {
  func.func @encoder_kernel(%arg0: i32, %arg1: memref<16x784xf32, #tpu.memory_space<vmem>>, %arg2: memref<784x128xbf16, #tpu.memory_space<vmem>>, %arg3: memref<1x128xf32, #tpu.memory_space<vmem>>, %arg4: memref<128x64xbf16, #tpu.memory_space<vmem>>, %arg5: memref<1x64xf32, #tpu.memory_space<vmem>>, %arg6: memref<16x64xf32, #tpu.memory_space<vmem>>) attributes {dimension_semantics = [#tpu.dimension_semantics<parallel>], iteration_bounds = array<i64: 1>, scalar_prefetch = 0 : i64, scratch_operands = 0 : i64, tpu.core_type = #tpu.core_type<tc>, window_params = [{transform_indices = @transform_0, window_bounds = array<i64: 16, 784>}, {pipeline_mode = #tpu.pipeline_mode<synchronous>, transform_indices = @transform_1, window_bounds = array<i64: 784, 128>}, {pipeline_mode = #tpu.pipeline_mode<synchronous>, transform_indices = @transform_2, window_bounds = array<i64: 1, 128>}, {pipeline_mode = #tpu.pipeline_mode<synchronous>, transform_indices = @transform_3, window_bounds = array<i64: 128, 64>}, {pipeline_mode = #tpu.pipeline_mode<synchronous>, transform_indices = @transform_4, window_bounds = array<i64: 1, 64>}, {transform_indices = @transform_5, window_bounds = array<i64: 16, 64>}]} {
    %c0 = arith.constant 0 : index
    %c0_0 = arith.constant 0 : index
    %0 = vector.load %arg1[%c0, %c0_0] : memref<16x784xf32, #tpu.memory_space<vmem>>, vector<16x784xf32>
    %1 = arith.truncf %0 : vector<16x784xf32> to vector<16x784xbf16>
    %c0_1 = arith.constant 0 : index
    %c0_2 = arith.constant 0 : index
    %2 = vector.load %arg2[%c0_1, %c0_2] : memref<784x128xbf16, #tpu.memory_space<vmem>>, vector<784x128xbf16>
    %cst = arith.constant dense<0.000000e+00> : vector<16x128xf32>
    %3 = tpu.matmul %1, %2, %cst {dimension_numbers = #tpu.dot_dimension_numbers<[1], [0], [0], [1], [0, 0, 1, 1], [], []>} : vector<16x784xbf16>, vector<784x128xbf16>, vector<16x128xf32> -> vector<16x128xf32>
    %c0_3 = arith.constant 0 : index
    %c0_4 = arith.constant 0 : index
    %4 = vector.load %arg3[%c0_3, %c0_4] : memref<1x128xf32, #tpu.memory_space<vmem>>, vector<1x128xf32>
    %5 = vector.broadcast %4 : vector<1x128xf32> to vector<16x128xf32>
    %6 = arith.addf %3, %5 : vector<16x128xf32>
    %cst_5 = arith.constant 0.000000e+00 : f32
    %7 = vector.broadcast %cst_5 : f32 to vector<16x128xf32>
    %8 = arith.subf %7, %6 : vector<16x128xf32>
    %9 = math.exp %8 : vector<16x128xf32>
    %cst_6 = arith.constant 1.000000e+00 : f32
    %10 = vector.broadcast %cst_6 : f32 to vector<16x128xf32>
    %11 = arith.addf %10, %9 : vector<16x128xf32>
    %12 = tpu.reciprocal %11 {approx = true} : vector<16x128xf32> -> vector<16x128xf32>
    %13 = arith.truncf %12 : vector<16x128xf32> to vector<16x128xbf16>
    %c0_7 = arith.constant 0 : index
    %c0_8 = arith.constant 0 : index
    %14 = vector.load %arg4[%c0_7, %c0_8] : memref<128x64xbf16, #tpu.memory_space<vmem>>, vector<128x64xbf16>
    %cst_9 = arith.constant dense<0.000000e+00> : vector<16x64xf32>
    %15 = tpu.matmul %13, %14, %cst_9 {dimension_numbers = #tpu.dot_dimension_numbers<[1], [0], [0], [1], [0, 0, 1, 1], [], []>} : vector<16x128xbf16>, vector<128x64xbf16>, vector<16x64xf32> -> vector<16x64xf32>
    %c0_10 = arith.constant 0 : index
    %c0_11 = arith.constant 0 : index
    %16 = vector.load %arg5[%c0_10, %c0_11] : memref<1x64xf32, #tpu.memory_space<vmem>>, vector<1x64xf32>
    %17 = vector.broadcast %16 : vector<1x64xf32> to vector<16x64xf32>
    %18 = arith.addf %15, %17 : vector<16x64xf32>
    %cst_12 = arith.constant 0.000000e+00 : f32
    %19 = vector.broadcast %cst_12 : f32 to vector<16x64xf32>
    %20 = arith.subf %19, %18 : vector<16x64xf32>
    %21 = math.exp %20 : vector<16x64xf32>
    %cst_13 = arith.constant 1.000000e+00 : f32
    %22 = vector.broadcast %cst_13 : f32 to vector<16x64xf32>
    %23 = arith.addf %22, %21 : vector<16x64xf32>
    %24 = tpu.reciprocal %23 {approx = true} : vector<16x64xf32> -> vector<16x64xf32>
    %c0_14 = arith.constant 0 : index
    %c0_15 = arith.constant 0 : index
    %25 = vector.load %arg6[%c0_14, %c0_15] : memref<16x64xf32, #tpu.memory_space<vmem>>, vector<16x64xf32>
    tpu.vector_store %arg6[%c0_14, %c0_15], %24 {strides = array<i32>} : memref<16x64xf32, #tpu.memory_space<vmem>>, vector<16x64xf32>,
    return
  }
  func.func @transform_0(%arg0: i32) -> (i32, i32) {
    %c0_i32 = arith.constant 0 : i32
    %c0_i32_0 = arith.constant 0 : i32
    return %arg0, %c0_i32 : i32, i32
  }
  func.func @transform_1(%arg0: i32) -> (i32, i32) {
    %c0_i32 = arith.constant 0 : i32
    %c0_i32_0 = arith.constant 0 : i32
    %c0_i32_1 = arith.constant 0 : i32
    return %c0_i32, %c0_i32_0 : i32, i32
  }
  func.func @transform_2(%arg0: i32) -> (i32, i32) {
    %c0_i32 = arith.constant 0 : i32
    %c0_i32_0 = arith.constant 0 : i32
    %c0_i32_1 = arith.constant 0 : i32
    return %c0_i32, %c0_i32_0 : i32, i32
  }
  func.func @transform_3(%arg0: i32) -> (i32, i32) {
    %c0_i32 = arith.constant 0 : i32
    %c0_i32_0 = arith.constant 0 : i32
    %c0_i32_1 = arith.constant 0 : i32
    return %c0_i32, %c0_i32_0 : i32, i32
  }
  func.func @transform_4(%arg0: i32) -> (i32, i32) {
    %c0_i32 = arith.constant 0 : i32
    %c0_i32_0 = arith.constant 0 : i32
    %c0_i32_1 = arith.constant 0 : i32
    return %c0_i32, %c0_i32_0 : i32, i32
  }
  func.func @transform_5(%arg0: i32) -> (i32, i32) {
    %c0_i32 = arith.constant 0 : i32
    %c0_i32_0 = arith.constant 0 : i32
    return %arg0, %c0_i32 : i32, i32
  }
}

</mosaic_0001>

<bundles_post_ra>
// kernel: encoder_forward.1
= control target key start
LH: loop header
LB: loop body
LE: loop exit
PB: predicated region body
PF: predicated region fallthrough
CT: control target
= control target key end

     0   :  { %10 = vsyncpa [#allocation3], 0  ;;  %s1027_s18 = smov [#allocation2]   ;;  %s1156_s0 = inlined_call_operand.vmem [shape: f32[16,784], index: 0, kind: input, shape index: {}]   ;;  %s1157_s1 = inlined_call_operand.hbm [shape: bf16[784,128], index: 1, kind: input, shape index: {}]   ;;  %s1158_s2 = inlined_call_operand.vmem [shape: f32[1,128], index: 2, kind: input, shape index: {}]   ;;  %s1159_s3 = inlined_call_operand.vmem [shape: bf16[128,64], index: 3, kind: input, shape index: {}]   ;;  %s1160_s4 = inlined_call_operand.vmem [shape: f32[1,64], index: 4, kind: input, shape index: {}]   ;;  %s1161_s5 = inlined_call_operand.vmem [shape: f32[16,64], index: 5, kind: output, shape index: {}]  }
   0x1   :  { %s18_s19 = sshll.u32 %s1027_s18, 4  ;;  %s19_s19 = int_to_ptr.vmem [resolvable:$true] %s18_s19 }
   0x2   :  { %s1013_s20 = scalar_lea.vmem %s19_s19, 6272  ;;  %p1018_p1 = scmp.lt.s32.totalorder %s19_s19, %s19_s19 }
   0x3   :  { %p1014_p0 = scmp.ne.s32.totalorder %s19_s19, %s1013_s20  ;;  %p1019_p2 = scmp.lt.s32.totalorder %s1013_s20, %s1013_s20 }
   0x5   :  { %p1020_p3 = por %p1019_p2, %p1018_p1 }
   0x7   :  { %p1021_p4 = pnand %p1020_p3, %p1014_p0 }
   0x9   :  { %1024 = shalt.err (!%p1021_p4)
}
   0xa   :  { %s1028_s21 = smov 64   ;;  %s1029_s22 = smov 4  }
   0xb   :  { %24 = dma.hbm_to_vmem [thread:$0]  %s1157_s1, 6272, %s19_s19, [#allocation3], %s1028_s21, %s1028_s21, %s1029_s22  }
   0xc   :  { %1025 = dma.done.wait [#allocation3], 6272  }
   0xd   :  { %1026 = vsyncadd [#allocation3], 4294961024  ;;  %v932_v0 = vld [vmem:[#allocation2 + $0x78] sm:$0xff]   ;;  %v936_v4 = vld [vmem:[#allocation2 + $0x70] sm:$0xff]   ;;  %v1030_v43 = vmov 0.0   ;;  %vm1031_vm0 = vmmov 0  }
   0xe   :  { %v933_v1 = vld [vmem:[#allocation2 + $0x38] sm:$0xff]   ;;  %824 = vmatprep.subr.bf16.mxu0 %v932_v0  ;;  %v937_v5 = vld [vmem:[#allocation2 + $0x30] sm:$0xff]   ;;  %v940_v8 = vld [vmem:[#allocation2 + $0x68] sm:$0xff]   ;;  %vm455_vm1 = vcmask 130048   ;;  %vm756_vm2 = vcmask 523264  }
   0xf   :  { %v934_v2 = vld [vmem:[#allocation2 + $0xf8] sm:$0xff]   ;;  %825 = vmatpush3.bf16.msra.mxu0 %v933_v1  ;;  %v938_v6 = vld [vmem:[#allocation2 + $0xf0] sm:$0xff]   ;;  %v941_v9 = vld [vmem:[#allocation2 + $0x28] sm:$0xff]  }
  0x10   :  { %v935_v3 = vld [vmem:[#allocation2 + $0xb8] sm:$0xff]   ;;  %846 = vmatprep.subr.bf16.mxu1 %v934_v2  ;;  %826 = vmatprep.subr.bf16.mxu0 %v936_v4  ;;  %v939_v7 = vld [vmem:[#allocation2 + $0xb0] sm:$0xff]   ;;  %v942_v10 = vld [vmem:[#allocation2 + $0xe8] sm:$0xff]  }
  0x11   :  { %847 = vmatpush3.bf16.msra.mxu1 %v935_v3  ;;  %v943_v11 = vld [vmem:[#allocation2 + $0xa8] sm:$0xff]   ;;  %v944_v12 = vld [vmem:[#allocation2 + $0x60] sm:$0xff]   ;;  %v948_v16 = vld [vmem:[#allocation2 + $0x58] sm:$0xff]  }
  0x12   :  { %848 = vmatprep.subr.bf16.mxu1 %v938_v6  ;;  %v945_v13 = vld [vmem:[#allocation2 + $0x20] sm:$0xff]   ;;  %v949_v17 = vld [vmem:[#allocation2 + $0x18] sm:$0xff]   ;;  %v952_v20 = vld [vmem:[#allocation2 + $0x50] sm:$0xff]  }
  0x13   :  { %827 = vmatpush3.bf16.msra.mxu0 %v937_v5  ;;  %v946_v14 = vld [vmem:[#allocation2 + $0xe0] sm:$0xff]   ;;  %v950_v18 = vld [vmem:[#allocation2 + $0xd8] sm:$0xff]   ;;  %v953_v21 = vld [vmem:[#allocation2 + $0x10] sm:$0xff]  }
  0x14   :  { %828 = vmatprep.subr.bf16.mxu0 %v940_v8  ;;  %v947_v15 = vld [vmem:[#allocation2 + $0xa0] sm:$0xff]   ;;  %v951_v19 = vld [vmem:[#allocation2 + $0x98] sm:$0xff]   ;;  %v954_v22 = vld [vmem:[#allocation2 + $0xd0] sm:$0xff]  }
  0x15   :  { %849 = vmatpush3.bf16.msra.mxu1 %v939_v7  ;;  %v955_v23 = vld [vmem:[#allocation2 + $0x90] sm:$0xff]   ;;  %v956_v24 = vld [vmem:[#allocation2 + $0x48] sm:$0xff]   ;;  %v960_v28 = vld [vmem:[#allocation2 + $0x40] sm:$0xff]  }
  0x16   :  { %850 = vmatprep.subr.bf16.mxu1 %v942_v10  ;;  %v957_v25 = vld [vmem:[#allocation2 + $0x8] sm:$0xff]   ;;  %v961_v29 = vld [vmem:[#allocation2] sm:$0xff]   ;;  %v42_v36 = vld [vmem:[%s1156_s0 + $0x38] sm:$0xff] }
  0x17   :  { %829 = vmatpush3.bf16.msra.mxu0 %v941_v9  ;;  %v958_v26 = vld [vmem:[#allocation2 + $0xc8] sm:$0xff]   ;;  %v962_v30 = vld [vmem:[#allocation2 + $0xc0] sm:$0xff]   ;;  %v964_v38 = vld [vmem:[#allocation2 + $0x178] sm:$0xff]  }
  0x18   :  { %830 = vmatprep.subr.bf16.mxu0 %v944_v12  ;;  %v959_v27 = vld [vmem:[#allocation2 + $0x88] sm:$0xff]   ;;  %v43_v32 = vld [vmem:[%s1156_s0 + $0x40] sm:$0xff]  ;;  %v38_v39 = vld [vmem:[%s1156_s0 + $0x18] sm:$0xff] }
  0x19   :  { %851 = vmatpush3.bf16.msra.mxu1 %v943_v11  ;;  %v36_v31 = vld [vmem:[%s1156_s0 + $0x8] sm:$0xff]  ;;  %v963_v34 = vld [vmem:[#allocation2 + $0x80] sm:$0xff]   ;;  %v45_v40 = vld [vmem:[%s1156_s0 + $0x50] sm:$0xff] }
  0x1a   :  { %852 = vmatprep.subr.bf16.mxu1 %v946_v14  ;;  %v50_v33 = vpack.c.bf16 %v43_v32, %v36_v31  ;;  %v35_v35 = vld [vmem:[%s1156_s0] sm:$0xff]  ;;  %v52_v41 = vpack.c.bf16 %v45_v40, %v38_v39  ;;  %v965_v42 = vld [vmem:[#allocation2 + $0x138] sm:$0xff]   ;;  %v37_v44 = vld [vmem:[%s1156_s0 + $0x10] sm:$0xff] }
  0x1b   :  { %831 = vmatpush3.bf16.msra.mxu0 %v945_v13  ;;  %v49_v37 = vpack.c.bf16 %v42_v36, %v35_v35  ;;  %v44_v45 = vld [vmem:[%s1156_s0 + $0x48] sm:$0xff]  ;;  %v966_v47 = vld [vmem:[#allocation2 + $0x170] sm:$0xff]   ;;  %v970_v51 = vld [vmem:[#allocation2 + $0x160] sm:$0xff]  }
  0x1c   :  { %832 = vmatprep.subr.bf16.mxu0 %v948_v16  ;;  %491 = vmatprep.mubr.bf16.mxu0 %v50_v33  ;;  %v51_v46 = vpack.c.bf16 %v44_v45, %v37_v44  ;;  %v967_v48 = vld [vmem:[#allocation2 + $0x130] sm:$0xff]   ;;  %v968_v49 = vld [vmem:[#allocation2 + $0x168] sm:$0xff]   ;;  %v971_v52 = vld [vmem:[#allocation2 + $0x120] sm:$0xff]  }
  0x1d   :  { %853 = vmatpush3.bf16.msra.mxu1 %v947_v15  ;;  %532 = vmatprep.mubr.bf16.mxu1 %v52_v41  ;;  %v969_v50 = vld [vmem:[#allocation2 + $0x128] sm:$0xff]   ;;  %v972_v53 = vld [vmem:[#allocation2 + $0x158] sm:$0xff]   ;;  %v974_v55 = vld [vmem:[#allocation2 + $0x150] sm:$0xff]  }
  0x1e   :  { %854 = vmatprep.subr.bf16.mxu1 %v950_v18  ;;  %v973_v54 = vld [vmem:[#allocation2 + $0x118] sm:$0xff]   ;;  %v980_v56 = vld [vmem:[#allocation2 + $0x180] sm:$0xff]   ;;  %v40_v57 = vld [vmem:[%s1156_s0 + $0x28] sm:$0xff] }
  0x1f   :  { %833 = vmatpush3.bf16.msra.mxu0 %v949_v17  ;;  %v975_v58 = vld [vmem:[#allocation2 + $0x110] sm:$0xff]   ;;  %v976_v59 = vld [vmem:[#allocation2 + $0x148] sm:$0xff]   ;;  %v47_v60 = vld [vmem:[%s1156_s0 + $0x60] sm:$0xff] }
  0x20   :  { %834 = vmatprep.subr.bf16.mxu0 %v952_v20  ;;  %v54_v61 = vpack.c.bf16 %v47_v60, %v40_v57  ;;  %v41_v62 = vld [vmem:[%s1156_s0 + $0x30] sm:$0xff]  ;;  %v48_v63 = vld [vmem:[%s1156_s0 + $0x68] sm:$0xff]  ;;  %v978_v2 = vld [vmem:[#allocation2 + $0x140] sm:$0xff]  }
  0x21   :  { %855 = vmatpush3.bf16.msra.mxu1 %v951_v19  ;;  %v55_v0 = vpack.c.bf16 %v48_v63, %v41_v62  ;;  %v977_v1 = vld [vmem:[#allocation2 + $0x108] sm:$0xff]   ;;  %v979_v3 = vld [vmem:[#allocation2 + $0x100] sm:$0xff]   ;;  %v46_v5 = vld [vmem:[%s1156_s0 + $0x58] sm:$0xff] }
  0x22   :  { %856 = vmatprep.subr.bf16.mxu1 %v954_v22  ;;  %v39_v4 = vld [vmem:[%s1156_s0 + $0x20] sm:$0xff]  ;;  %v981_v7 = vld [vmem:[%s1159_s3 + $0x38] sm:$0xff]   ;;  %v982_v8 = vld [vmem:[%s1159_s3 + $0x30] sm:$0xff]  }
  0x23   :  { %835 = vmatpush3.bf16.msra.mxu0 %v953_v21  ;;  %v53_v6 = vpack.c.bf16 %v46_v5, %v39_v4  ;;  %v983_v9 = vld [vmem:[%s1159_s3 + $0x28] sm:$0xff]   ;;  %v984_v10 = vld [vmem:[%s1159_s3 + $0x20] sm:$0xff]   ;;  %v985_v11 = vld [vmem:[%s1159_s3 + $0x18] sm:$0xff]  }
  0x24   :  { %836 = vmatprep.subr.bf16.mxu0 %v956_v24  ;;  %v986_v12 = vld [vmem:[%s1159_s3 + $0x10] sm:$0xff]   ;;  %v987_v13 = vld [vmem:[%s1159_s3 + $0x8] sm:$0xff]   ;;  %v988_v14 = vld [vmem:[%s1159_s3] sm:$0xff]  }
  0x25   :  { %857 = vmatpush3.bf16.msra.mxu1 %v955_v23  ;;  %v815_v57 = vld [vmem:[%s1160_s4] ss:$0 sm:$0xff] }
  0x26   :  { %858 = vmatprep.subr.bf16.mxu1 %v958_v26 }
  0x27   :  { %837 = vmatpush3.bf16.msra.mxu0 %v957_v25 }
  0x28   :  { %838 = vmatprep.subr.bf16.mxu0 %v960_v28 }
  0x29   :  { %859 = vmatpush3.bf16.msra.mxu1 %v959_v27  ;;  %v764_v27 = vld [vmem:[%s1158_s2] ss:$0 sm:$0xff] }
  0x2a   :  { %860 = vmatprep.subr.bf16.mxu1 %v962_v30 }
  0x2b   :  { %839 = vmatpush3.bf16.msra.mxu0 %v961_v29 }
  0x2c   :  { %868 = vmatprep.subr.bf16.mxu0 %v964_v38 }
  0x2d   :  { %861 = vmatpush3.bf16.msra.mxu1 %v963_v34 }
  0x2e   :  { %901 = vmatprep.subr.bf16.mxu1 %v1030_v43  ;;  %492 = vmatmul.mubr.bf16.vlgmr.msra.gmra.mxu0 %v49_v37 }
  0x2f   :  { %869 = vmatpush3.bf16.msra.mxu0 %v965_v42  ;;  %573 = vmatprep.mubr.bf16.mxu0 %v54_v61 }
  0x30   :  { %533 = vmatmul.mubr.bf16.vlgmr.msra.gmra.mxu1 %v51_v46  ;;  %870 = vmatprep.subr.bf16.mxu0 %v966_v47 }
  0x31   :  { %903 = vmatprep.mubr.msk.bf16.mxu1 %vm1031_vm0, %v1030_v43  ;;  %902 = vmatpush3.bf16.msra.mxu1 %v980_v56 }
  0x32   :  { %907 = vmatprep.subr.bf16.mxu1 %v1030_v43 }
  0x33   :  { %871 = vmatpush3.bf16.msra.mxu0 %v967_v48 }
  0x34   :  { %872 = vmatprep.subr.bf16.mxu0 %v968_v49 }
  0x37   :  { %873 = vmatpush3.bf16.msra.mxu0 %v969_v50 }
  0x38   :  { %874 = vmatprep.subr.bf16.mxu0 %v970_v51  ;;  %904 = vmatmul.mubr.msk.bf16.vlgmr.msra.gmra.mxu1 %vm455_vm1, %v55_v0 }
  0x39   :  { %923 = vmatprep.mubr.msk.bf16.mxu1 %vm1031_vm0, %v1030_v43  ;;  %908 = vmatpush3.bf16.msra.mxu1 %v981_v7 }
  0x3a   :  { %909 = vmatprep.subr.bf16.mxu1 %v1030_v43 }
  0x3b   :  { %875 = vmatpush3.bf16.msra.mxu0 %v971_v52 }
  0x3c   :  { %876 = vmatprep.subr.bf16.mxu0 %v972_v53 }
  0x3d   :  { %910 = vmatpush3.bf16.msra.mxu1 %v982_v8 }
  0x3e   :  { %911 = vmatprep.subr.bf16.mxu1 %v1030_v43 }
  0x3f   :  { %877 = vmatpush3.bf16.msra.mxu0 %v973_v54 }
  0x40   :  { %878 = vmatprep.subr.bf16.mxu0 %v974_v55 }
  0x41   :  { %912 = vmatpush3.bf16.msra.mxu1 %v983_v9 }
  0x42   :  { %913 = vmatprep.subr.bf16.mxu1 %v1030_v43 }
  0x43   :  { %879 = vmatpush3.bf16.msra.mxu0 %v975_v58 }
  0x44   :  { %880 = vmatprep.subr.bf16.mxu0 %v976_v59 }
  0x45   :  { %914 = vmatpush3.bf16.msra.mxu1 %v984_v10 }
  0x46   :  { %915 = vmatprep.subr.bf16.mxu1 %v1030_v43 }
  0x47   :  { %881 = vmatpush3.bf16.msra.mxu0 %v977_v1 }
  0x48   :  { %882 = vmatprep.subr.bf16.mxu0 %v978_v2 }
  0x49   :  { %916 = vmatpush3.bf16.msra.mxu1 %v985_v11 }
  0x4a   :  { %917 = vmatprep.subr.bf16.mxu1 %v1030_v43 }
  0x4b   :  { %883 = vmatpush3.bf16.msra.mxu0 %v979_v3 }
  0x4d   :  { %918 = vmatpush3.bf16.msra.mxu1 %v986_v12 }
  0x4e   :  { %574 = vmatmul.mubr.bf16.vlgmr.msra.gmra.mxu0 %v53_v6  ;;  %919 = vmatprep.subr.bf16.mxu1 %v1030_v43 }
  0x51   :  { %920 = vmatpush3.bf16.msra.mxu1 %v987_v13 }
  0x52   :  { %921 = vmatprep.subr.bf16.mxu1 %v1030_v43 }
  0x55   :  { %922 = vmatpush3.bf16.msra.mxu1 %v988_v14 }
  0xee   :  { %v840_v18 = vpop.f32.mrf.mxu0 }
  0xf0   :  { %v862_v15 = vpop.f32.mrf.mxu1  ;;  %v841_v20 = vpop.f32.mrf.mxu0 }
  0xf1   :  { %v842_v26 = vadd.f32 %v841_v20, %v840_v18 }
  0xf2   :  { %v863_v16 = vpop.f32.mrf.mxu1  ;;  %v843_v23 = vpop.f32.mrf.mxu0 }
  0xf3   :  { %v494_v29 = vadd.f32 %v842_v26, %v764_v27  ;;  %v864_v30 = vadd.f32 %v863_v16, %v862_v15 }
  0xf4   :  { %v865_v17 = vpop.f32.mrf.mxu1  ;;  %v844_v28 = vpop.f32.mrf.mxu0 }
  0xf5   :  { %v845_v31 = vadd.f32 %v844_v28, %v843_v23  ;;  %v535_v34 = vadd.f32 %v864_v30, %v494_v29 }
  0xf6   :  { %v866_v19 = vpop.f32.mrf.mxu1 }
  0xf7   :  { %v497_v35 = vadd.f32 %v845_v31, %v764_v27  ;;  %v867_v36 = vadd.f32 %v866_v19, %v865_v17 }
  0xf8   :  { %v616_v21 = vpop.f32.mrf.mxu1 }
  0xf9   :  { %v538_v41 = vadd.f32 %v867_v36, %v497_v35 }
  0xfa   :  { %v905_v22 = vpop.f32.mrf.mxu1 }
  0xfc   :  { %v619_v24 = vpop.f32.mrf.mxu1 }
  0xfe   :  { %v906_v25 = vpop.f32.mrf.mxu1 }
 0x10e   :  { %v884_v32 = vpop.f32.mrf.mxu0 }
 0x110   :  { %v885_v33 = vpop.f32.mrf.mxu0 }
 0x111   :  { %v886_v37 = vadd.f32 %v885_v33, %v884_v32 }
 0x112   :  { %v887_v38 = vpop.f32.mrf.mxu0 }
 0x113   :  { %v576_v39 = vadd.f32 %v886_v37, %v535_v34 }
 0x114   :  { %v888_v40 = vpop.f32.mrf.mxu0 }
 0x115   :  { %v617_v42 = vadd.f32 %v616_v21, %v576_v39  ;;  %v889_v43 = vadd.f32 %v888_v40, %v887_v38 }
 0x117   :  { %v623_v44 = vsub.f32 0.0, %v617_v42  ;;  %v579_v45 = vadd.f32 %v889_v43, %v538_v41 }
 0x119   :  { %v625_v46 = vmul.f32 1.442695, %v623_v44  ;;  %v620_v47 = vadd.f32 %v619_v24, %v579_v45 }
 0x11b   :  { %989 = vpow2.f32 %v625_v46  ;;  %v624_v48 = vsub.f32 0.0, %v620_v47 }
 0x11d   :  { %v627_v49 = vmul.f32 1.442695, %v624_v48 }
 0x11f   :  { %991 = vpow2.f32 %v627_v49 }
 0x128   :  { %v990_v50 = vpop.eup %989 }
 0x129   :  { %v629_v51 = vadd.f32 1.0, %v990_v50 }
 0x12b   :  { %993 = vrcp.f32 %v629_v51 }
 0x12c   :  { %v992_v52 = vpop.eup %991 }
 0x12d   :  { %v630_v53 = vadd.f32 1.0, %v992_v52 }
 0x12f   :  { %995 = vrcp.f32 %v630_v53 }
 0x138   :  { %v994_v54 = vpop.eup %993 }
 0x13c   :  { %v996_v55 = vpop.eup %995 }
 0x13d   :  { %v633_v56 = vpack.c.bf16 %v996_v55, %v994_v54 }
 0x13f   :  { %924 = vmatmul.mubr.bf16.vlgmr.msra.gmra.mxu1 %v633_v56 }
 0x1ff   :  { %v739_v58 = vpop.f32.mrf.mxu1 }
 0x200   :  { %v740_v59 = vadd.f32 %v815_v57, %v739_v58 }
 0x201   :  { %v925_v60 = vpop.f32.mrf.mxu1 }
 0x202   :  { %v746_v61 = vsub.f32 0.0, %v740_v59 }
 0x203   :  { %v742_v62 = vpop.f32.mrf.mxu1 }
 0x204   :  { %v748_v63 = vmul.f32 1.442695, %v746_v61  ;;  %v743_v0 = vadd.f32 %v815_v57, %v742_v62 }
 0x205   :  { %v926_v1 = vpop.f32.mrf.mxu1 }
 0x206   :  { %997 = vpow2.f32 %v748_v63  ;;  %v747_v2 = vsub.f32 0.0, %v743_v0 }
 0x208   :  { %v750_v3 = vmul.f32 1.442695, %v747_v2 }
 0x20a   :  { %999 = vpow2.f32 %v750_v3 }
 0x213   :  { %v998_v4 = vpop.eup %997 }
 0x214   :  { %v752_v5 = vadd.f32 1.0, %v998_v4 }
 0x216   :  { %1001 = vrcp.f32 %v752_v5 }
 0x217   :  { %v1000_v6 = vpop.eup %999 }
 0x218   :  { %v753_v7 = vadd.f32 1.0, %v1000_v6 }
 0x21a   :  { %1003 = vrcp.f32 %v753_v7 }
 0x223   :  { %v1002_v8 = vpop.eup %1001 }
 0x224   :  { %757 = vst.msk [vmem:[%s1161_s5] sm:$0xff] %vm756_vm2, %v1002_v8 }
 0x227   :  { %v1004_v9 = vpop.eup %1003 }
 0x228   :  { %758 = vst.msk [vmem:[%s1161_s5 + $0x8] sm:$0xff] %vm756_vm2, %v1004_v9 }
 0x229   :  { %763 = vsyncpa [#allocation3], 1 }

</bundles_post_ra>
